<compile_context>
chip_gen: v7x
topology: tpu7x:2x2x1
jax: 0.10.0
libtpu: 0.0.40
codegen_flags: <defaults>
</compile_context>

<pallas_src>
import functools

import jax
import jax.numpy as jnp
from jax import lax
from jax.experimental import pallas as pl
from jax.experimental.pallas import tpu as pltpu

SMOOTH = 1e-5


def _vmem_capacity_bytes():
    """Physical VMEM of the attached chip; conservative 64 MiB (v7x) fallback."""
    try:
        cap = getattr(pltpu.get_tpu_info(), "vmem_capacity_bytes", None)
        if cap:
            return int(cap)
    except Exception:
        pass
    return 64 << 20


def _hard_dice_kernel(x_ref, y_ref, dice_ref, inter_acc, pcnt_acc, ycnt_acc,
                      *, tiled_axis, axis_limit):
    """Blocks are (1, C, St, L); accumulators are (C, L) f32.

    tiled_axis: which block axis (2 or 3) the HW grid axis tiles.
    axis_limit: number of valid positions along that axis (None = exact fit).
    """
    k = pl.program_id(1)
    nk = pl.num_programs(1)
    _, c, st, l = x_ref.shape

    @pl.when(k == 0)
    def _init():
        inter_acc[...] = jnp.zeros_like(inter_acc)
        pcnt_acc[...] = jnp.zeros_like(pcnt_acc)
        ycnt_acc[...] = jnp.zeros_like(ycnt_acc)

    # Tail mask along the tiled spatial axis only — a small (St,1) / (1,L)
    # iota, never a full tile-sized materialization.
    if axis_limit is None:
        valid = None
    elif tiled_axis == 2:
        idx = lax.broadcasted_iota(jnp.int32, (st, 1), 0) + k * st
        valid = idx < axis_limit
    else:
        idx = lax.broadcasted_iota(jnp.int32, (1, l), 1) + k * l
        valid = idx < axis_limit

    # Element-wise running max across the C class planes (pure VPU).
    m = x_ref[0, 0]
    for ci in range(1, c):
        m = jnp.maximum(m, x_ref[0, ci])

    # First-occurrence argmax (torch.argmax tie-breaking): class ci is the
    # prediction iff it equals the max and no smaller class already matched.
    taken = None
    for ci in range(c):
        eq = x_ref[0, ci] == m
        hit = eq if taken is None else jnp.logical_and(eq, jnp.logical_not(taken))
        if ci + 1 < c:
            taken = eq if taken is None else jnp.logical_or(taken, eq)

        yc = y_ref[0, ci].astype(jnp.float32)
        if valid is not None:
            hit = jnp.logical_and(hit, valid)
            yc = jnp.where(valid, yc, 0.0)

        # Lane-resident partial sums (sublane reduce only in the hot loop).
        inter_acc[ci, :] += jnp.sum(jnp.where(hit, yc, 0.0), axis=0)
        pcnt_acc[ci, :] += jnp.sum(jnp.where(hit, 1.0, 0.0), axis=0)
        ycnt_acc[ci, :] += jnp.sum(yc, axis=0)

    @pl.when(k == nk - 1)
    def _finalize():
        inter = jnp.sum(inter_acc[...], axis=1) + SMOOTH                 # (C,)
        union = (jnp.sum(pcnt_acc[...], axis=1)
                 + jnp.sum(ycnt_acc[...], axis=1) + SMOOTH)              # (C,)
        dice_ref[0, 0, :] = 2.0 * inter / union


def hard_dice_score(digits, y_true, *, block_rows=None, block_lanes=None):
    """digits: (N, C, H, W) logits; y_true: (N, C, H, W) one-hot (any dtype).

    Returns the scalar hard dice score: mean over batch and classes 1..C-1.
    block_rows / block_lanes force small tiles (testing only).
    """
    n, c, h, w = digits.shape
    assert y_true.shape == digits.shape
    hw = h * w

    x_item = jnp.dtype(digits.dtype).itemsize
    y_item = jnp.dtype(y_true.dtype).itemsize
    vmem_cap = _vmem_capacity_bytes()
    # Logical bytes for one (x, y) block pair: big enough to amortize the
    # ~0.35us per-grid-step overhead, small enough for double-buffering to fit
    # comfortably on every generation (128 MiB v5e/v6e, 64 MiB v7x).
    pair_target = min(16 << 20, vmem_cap // 8)

    if hw % 128 == 0:
        # Dense layout: spatial viewed as (S, 128) — free reshape, no C->8
        # sublane padding, per-plane element-wise argmax.
        rows = hw // 128
        xr = digits.reshape(n, c, rows, 128)
        yr = y_true.reshape(n, c, rows, 128)
        if block_rows is not None:
            st = block_rows
        else:
            st = max(8, (pair_target // (c * 128 * (x_item + y_item))) // 8 * 8)
        if st >= rows:
            st = rows                        # full extent (allowed by BlockSpec)
        nk = pl.cdiv(rows, st)
        block = (1, c, st, 128)
        index_map = lambda i, k: (i, 0, k, 0)
        tiled_axis, limit, covered = 2, rows, None
        lanes = 128
        pair_phys = c * (-(-st // 8) * 8) * 128 * (x_item + y_item)
        covered = nk * st
    else:
        # Ragged fallback: HW stays flat on the lane axis (St = 1).
        xr = digits.reshape(n, c, 1, hw)
        yr = y_true.reshape(n, c, 1, hw)
        if block_lanes is not None:
            lanes = block_lanes
        else:
            # The 1->8 sublane padding of (1, lanes) planes is VMEM-only; size
            # the tile against physical bytes.
            lanes = max(128, (pair_target // (c * 8 * (x_item + y_item))) // 128 * 128)
        if lanes >= hw:
            lanes = hw                       # full extent
        nk = pl.cdiv(hw, lanes)
        st = 1
        block = (1, c, 1, lanes)
        index_map = lambda i, k: (i, 0, 0, k)
        tiled_axis, limit = 3, hw
        pair_phys = c * 8 * lanes * (x_item + y_item)
        covered = nk * lanes

    axis_limit = None if covered == limit else limit

    acc_bytes = 3 * max(c, 8) * lanes * 4
    temps = 8 * st * lanes * 4               # headroom for Mosaic value temporaries
    need = 2 * pair_phys + temps + acc_bytes + (4 << 20)
    vmem_limit = int(min(max(need, 32 << 20), vmem_cap - (4 << 20)))

    kernel = functools.partial(_hard_dice_kernel,
                               tiled_axis=tiled_axis, axis_limit=axis_limit)

    dice = pl.pallas_call(
        kernel,
        out_shape=jax.ShapeDtypeStruct((n, 1, c), jnp.float32),
        grid_spec=pltpu.PrefetchScalarGridSpec(
            num_scalar_prefetch=0,
            grid=(n, nk),                                 # HW reduction axis last
            in_specs=[pl.BlockSpec(block, index_map),
                      pl.BlockSpec(block, index_map)],
            out_specs=pl.BlockSpec((1, 1, c), lambda i, k: (i, 0, 0)),
            scratch_shapes=[pltpu.VMEM((c, lanes), jnp.float32)] * 3,
        ),
        # TODO(synk): on v7x consider pltpu.CORE_PARALLEL on the batch axis (or
        # an explicit core_map) so both TensorCores split the grid; plain
        # "parallel" kept here for portability across v5e/v6e/v7x.
        compiler_params=pltpu.CompilerParams(
            dimension_semantics=("parallel", "arbitrary"),
            vmem_limit_bytes=vmem_limit),
    )(xr, yr)

    dice = dice[:, 0, :]                                   # (N, C)
    # Tiny O(N*C) epilogue: mean over batch and classes 1..C-1 (skip bg).
    return jnp.mean(dice[:, 1:])


def _reference(digits, y_true):
    # Pure-JAX reference mirroring the PyTorch module.
    c = y_true.shape[1]
    pred = jnp.argmax(digits, axis=1)
    onehot = jax.nn.one_hot(pred, c, dtype=jnp.float32)           # (N, H, W, C)
    onehot = jnp.transpose(onehot, (0, 3, 1, 2))                  # (N, C, H, W)
    yf = y_true.astype(jnp.float32)
    inter = jnp.sum(onehot * yf, axis=(2, 3)) + SMOOTH
    union = jnp.sum(onehot, axis=(2, 3)) + jnp.sum(yf, axis=(2, 3)) + SMOOTH
    dice = 2.0 * inter / union
    return jnp.mean(dice[:, 1:])


def _make_inputs(key, n, c, h, w):
    k1, k2 = jax.random.split(key)
    digits = jax.random.normal(k1, (n, c, h, w), dtype=jnp.float32)
    labels = jax.random.randint(k2, (n, h, w), 0, c)
    y_true = jnp.transpose(
        jax.nn.one_hot(labels, c, dtype=jnp.float32), (0, 3, 1, 2))
    return digits, y_true


if __name__ == "__main__":
    key = jax.random.PRNGKey(0)

    # Primary small-shape check (dense layout, single tile).
    d1, y1 = _make_inputs(key, 2, 4, 16, 16)
    out1 = hard_dice_score(d1, y1)
    jax.block_until_ready(out1)
    assert jnp.allclose(out1, _reference(d1, y1), rtol=1e-5, atol=1e-6), (
        out1, _reference(d1, y1))

    # Dense layout, multi-tile with masked row tail (18 rows, forced St=8).
    k1, _ = jax.random.split(key)
    d2, y2 = _make_inputs(k1, 2, 4, 48, 48)
    out2 = hard_dice_score(d2, y2, block_rows=8)
    jax.block_until_ready(out2)
    assert jnp.allclose(out2, _reference(d2, y2), rtol=1e-5, atol=1e-6)

    # Ragged HW (400 lanes), multi-tile with masked lane tail (forced 256).
    k2, _ = jax.random.split(k1)
    d3, y3 = _make_inputs(k2, 2, 3, 20, 20)
    out3 = hard_dice_score(d3, y3, block_lanes=256)
    jax.block_until_ready(out3)
    assert jnp.allclose(out3, _reference(d3, y3), rtol=1e-5, atol=1e-6)

    # Ragged HW, default (single full-extent tile).
    out4 = hard_dice_score(d3, y3)
    jax.block_until_ready(out4)
    assert jnp.allclose(out4, _reference(d3, y3), rtol=1e-5, atol=1e-6)

    print("KERNEL_OK")
</pallas_src>

<mosaic_0001>
module attributes {stable_mosaic.version = 11 : i64} {
  func.func @_hard_dice_kernel(%arg0: i32, %arg1: i32, %arg2: memref<1x4x2x128xf32, #tpu.memory_space<vmem>>, %arg3: memref<1x4x2x128xf32, #tpu.memory_space<vmem>>, %arg4: memref<1x1x4xf32, #tpu.memory_space<vmem>>, %arg5: memref<4x128xf32, #tpu.memory_space<vmem>>, %arg6: memref<4x128xf32, #tpu.memory_space<vmem>>, %arg7: memref<4x128xf32, #tpu.memory_space<vmem>>) attributes {dimension_semantics = [#tpu.dimension_semantics<parallel>, #tpu.dimension_semantics<arbitrary>], iteration_bounds = array<i64: 2, 1>, scalar_prefetch = 0 : i64, scratch_operands = 3 : i64, tpu.core_type = #tpu.core_type<tc>, window_params = [{transform_indices = @transform_0, window_bounds = array<i64: 1, 4, 2, 128>}, {transform_indices = @transform_1, window_bounds = array<i64: 1, 4, 2, 128>}, {transform_indices = @transform_2, window_bounds = array<i64: 1, 1, 4>}]} {
    %c0_i32 = arith.constant 0 : i32
    %0 = arith.cmpi eq, %arg1, %c0_i32 : i32
    %1 = arith.extui %0 : i1 to i32
    %c0_i32_0 = arith.constant 0 : i32
    %2 = arith.cmpi ne, %1, %c0_i32_0 : i32
    scf.if %2 {
      %cst_121 = arith.constant 0.000000e+00 : f32
      %149 = vector.broadcast %cst_121 : f32 to vector<4x128xf32>
      %c0_122 = arith.constant 0 : index
      %c0_123 = arith.constant 0 : index
      %150 = vector.load %arg5[%c0_122, %c0_123] : memref<4x128xf32, #tpu.memory_space<vmem>>, vector<4x128xf32>
      tpu.vector_store %arg5[%c0_122, %c0_123], %149 {strides = array<i32>} : memref<4x128xf32, #tpu.memory_space<vmem>>, vector<4x128xf32>,
      %cst_124 = arith.constant 0.000000e+00 : f32
      %151 = vector.broadcast %cst_124 : f32 to vector<4x128xf32>
      %c0_125 = arith.constant 0 : index
      %c0_126 = arith.constant 0 : index
      %152 = vector.load %arg6[%c0_125, %c0_126] : memref<4x128xf32, #tpu.memory_space<vmem>>, vector<4x128xf32>
      tpu.vector_store %arg6[%c0_125, %c0_126], %151 {strides = array<i32>} : memref<4x128xf32, #tpu.memory_space<vmem>>, vector<4x128xf32>,
      %cst_127 = arith.constant 0.000000e+00 : f32
      %153 = vector.broadcast %cst_127 : f32 to vector<4x128xf32>
      %c0_128 = arith.constant 0 : index
      %c0_129 = arith.constant 0 : index
      %154 = vector.load %arg7[%c0_128, %c0_129] : memref<4x128xf32, #tpu.memory_space<vmem>>, vector<4x128xf32>
      tpu.vector_store %arg7[%c0_128, %c0_129], %153 {strides = array<i32>} : memref<4x128xf32, #tpu.memory_space<vmem>>, vector<4x128xf32>,
    } else {
    }
    %c0 = arith.constant 0 : index
    %c0_1 = arith.constant 0 : index
    %c0_2 = arith.constant 0 : index
    %c0_3 = arith.constant 0 : index
    %3 = vector.load %arg2[%c0, %c0_1, %c0_2, %c0_3] : memref<1x4x2x128xf32, #tpu.memory_space<vmem>>, vector<1x1x2x128xf32>
    %4 = vector.shape_cast %3 : vector<1x1x2x128xf32> to vector<2x128xf32>
    %c0_4 = arith.constant 0 : index
    %c1 = arith.constant 1 : index
    %c0_5 = arith.constant 0 : index
    %c0_6 = arith.constant 0 : index
    %5 = vector.load %arg2[%c0_4, %c1, %c0_5, %c0_6] : memref<1x4x2x128xf32, #tpu.memory_space<vmem>>, vector<1x1x2x128xf32>
    %6 = vector.shape_cast %5 : vector<1x1x2x128xf32> to vector<2x128xf32>
    %7 = arith.maximumf %4, %6 : vector<2x128xf32>
    %c0_7 = arith.constant 0 : index
    %c2 = arith.constant 2 : index
    %c0_8 = arith.constant 0 : index
    %c0_9 = arith.constant 0 : index
    %8 = vector.load %arg2[%c0_7, %c2, %c0_8, %c0_9] : memref<1x4x2x128xf32, #tpu.memory_space<vmem>>, vector<1x1x2x128xf32>
    %9 = vector.shape_cast %8 : vector<1x1x2x128xf32> to vector<2x128xf32>
    %10 = arith.maximumf %7, %9 : vector<2x128xf32>
    %c0_10 = arith.constant 0 : index
    %c3 = arith.constant 3 : index
    %c0_11 = arith.constant 0 : index
    %c0_12 = arith.constant 0 : index
    %11 = vector.load %arg2[%c0_10, %c3, %c0_11, %c0_12] : memref<1x4x2x128xf32, #tpu.memory_space<vmem>>, vector<1x1x2x128xf32>
    %12 = vector.shape_cast %11 : vector<1x1x2x128xf32> to vector<2x128xf32>
    %13 = arith.maximumf %10, %12 : vector<2x128xf32>
    %c0_13 = arith.constant 0 : index
    %c0_14 = arith.constant 0 : index
    %c0_15 = arith.constant 0 : index
    %c0_16 = arith.constant 0 : index
    %14 = vector.load %arg2[%c0_13, %c0_14, %c0_15, %c0_16] : memref<1x4x2x128xf32, #tpu.memory_space<vmem>>, vector<1x1x2x128xf32>
    %15 = vector.shape_cast %14 : vector<1x1x2x128xf32> to vector<2x128xf32>
    %16 = arith.cmpf oeq, %15, %13 : vector<2x128xf32>
    %c0_17 = arith.constant 0 : index
    %c0_18 = arith.constant 0 : index
    %c0_19 = arith.constant 0 : index
    %c0_20 = arith.constant 0 : index
    %17 = vector.load %arg3[%c0_17, %c0_18, %c0_19, %c0_20] : memref<1x4x2x128xf32, #tpu.memory_space<vmem>>, vector<1x1x2x128xf32>
    %18 = vector.shape_cast %17 : vector<1x1x2x128xf32> to vector<2x128xf32>
    %c0_21 = arith.constant 0 : index
    %c0_22 = arith.constant 0 : index
    %19 = vector.load %arg5[%c0_21, %c0_22] : memref<4x128xf32, #tpu.memory_space<vmem>>, vector<1x128xf32>
    %20 = vector.shape_cast %19 : vector<1x128xf32> to vector<128xf32>
    %cst = arith.constant 0.000000e+00 : f32
    %21 = vector.broadcast %cst : f32 to vector<2x128xf32>
    %22 = arith.select %16, %18, %21 : vector<2x128xi1>, vector<2x128xf32>
    %cst_23 = arith.constant dense<0.000000e+00> : vector<128xf32>
    %23 = vector.multi_reduction <add>, %22, %cst_23 [0] : vector<2x128xf32> to vector<128xf32>
    %24 = arith.addf %20, %23 : vector<128xf32>
    %c0_24 = arith.constant 0 : index
    %c0_25 = arith.constant 0 : index
    %25 = vector.load %arg5[%c0_24, %c0_25] : memref<4x128xf32, #tpu.memory_space<vmem>>, vector<1x128xf32>
    %26 = vector.shape_cast %25 : vector<1x128xf32> to vector<128xf32>
    %27 = vector.shape_cast %24 : vector<128xf32> to vector<1x128xf32>
    tpu.vector_store %arg5[%c0_24, %c0_25], %27 {strides = array<i32>} : memref<4x128xf32, #tpu.memory_space<vmem>>, vector<1x128xf32>,
    %c0_26 = arith.constant 0 : index
    %c0_27 = arith.constant 0 : index
    %28 = vector.load %arg6[%c0_26, %c0_27] : memref<4x128xf32, #tpu.memory_space<vmem>>, vector<1x128xf32>
    %29 = vector.shape_cast %28 : vector<1x128xf32> to vector<128xf32>
    %cst_28 = arith.constant 1.000000e+00 : f32
    %cst_29 = arith.constant 0.000000e+00 : f32
    %30 = vector.broadcast %cst_28 : f32 to vector<2x128xf32>
    %31 = vector.broadcast %cst_29 : f32 to vector<2x128xf32>
    %32 = arith.select %16, %30, %31 : vector<2x128xi1>, vector<2x128xf32>
    %cst_30 = arith.constant dense<0.000000e+00> : vector<128xf32>
    %33 = vector.multi_reduction <add>, %32, %cst_30 [0] : vector<2x128xf32> to vector<128xf32>
    %34 = arith.addf %29, %33 : vector<128xf32>
    %c0_31 = arith.constant 0 : index
    %c0_32 = arith.constant 0 : index
    %35 = vector.load %arg6[%c0_31, %c0_32] : memref<4x128xf32, #tpu.memory_space<vmem>>, vector<1x128xf32>
    %36 = vector.shape_cast %35 : vector<1x128xf32> to vector<128xf32>
    %37 = vector.shape_cast %34 : vector<128xf32> to vector<1x128xf32>
    tpu.vector_store %arg6[%c0_31, %c0_32], %37 {strides = array<i32>} : memref<4x128xf32, #tpu.memory_space<vmem>>, vector<1x128xf32>,
    %c0_33 = arith.constant 0 : index
    %c0_34 = arith.constant 0 : index
    %38 = vector.load %arg7[%c0_33, %c0_34] : memref<4x128xf32, #tpu.memory_space<vmem>>, vector<1x128xf32>
    %39 = vector.shape_cast %38 : vector<1x128xf32> to vector<128xf32>
    %cst_35 = arith.constant dense<0.000000e+00> : vector<128xf32>
    %40 = vector.multi_reduction <add>, %18, %cst_35 [0] : vector<2x128xf32> to vector<128xf32>
    %41 = arith.addf %39, %40 : vector<128xf32>
    %c0_36 = arith.constant 0 : index
    %c0_37 = arith.constant 0 : index
    %42 = vector.load %arg7[%c0_36, %c0_37] : memref<4x128xf32, #tpu.memory_space<vmem>>, vector<1x128xf32>
    %43 = vector.shape_cast %42 : vector<1x128xf32> to vector<128xf32>
    %44 = vector.shape_cast %41 : vector<128xf32> to vector<1x128xf32>
    tpu.vector_store %arg7[%c0_36, %c0_37], %44 {strides = array<i32>} : memref<4x128xf32, #tpu.memory_space<vmem>>, vector<1x128xf32>,
    %c0_38 = arith.constant 0 : index
    %c1_39 = arith.constant 1 : index
    %c0_40 = arith.constant 0 : index
    %c0_41 = arith.constant 0 : index
    %45 = vector.load %arg2[%c0_38, %c1_39, %c0_40, %c0_41] : memref<1x4x2x128xf32, #tpu.memory_space<vmem>>, vector<1x1x2x128xf32>
    %46 = vector.shape_cast %45 : vector<1x1x2x128xf32> to vector<2x128xf32>
    %47 = arith.cmpf oeq, %46, %13 : vector<2x128xf32>
    %cst_42 = arith.constant dense<true> : vector<2x128xi1>
    %48 = arith.xori %16, %cst_42 : vector<2x128xi1>
    %49 = arith.andi %47, %48 : vector<2x128xi1>
    %50 = arith.ori %16, %47 : vector<2x128xi1>
    %c0_43 = arith.constant 0 : index
    %c1_44 = arith.constant 1 : index
    %c0_45 = arith.constant 0 : index
    %c0_46 = arith.constant 0 : index
    %51 = vector.load %arg3[%c0_43, %c1_44, %c0_45, %c0_46] : memref<1x4x2x128xf32, #tpu.memory_space<vmem>>, vector<1x1x2x128xf32>
    %52 = vector.shape_cast %51 : vector<1x1x2x128xf32> to vector<2x128xf32>
    %c1_47 = arith.constant 1 : index
    %c0_48 = arith.constant 0 : index
    %53 = vector.load %arg5[%c1_47, %c0_48] : memref<4x128xf32, #tpu.memory_space<vmem>>, vector<1x128xf32>
    %54 = vector.shape_cast %53 : vector<1x128xf32> to vector<128xf32>
    %cst_49 = arith.constant 0.000000e+00 : f32
    %55 = vector.broadcast %cst_49 : f32 to vector<2x128xf32>
    %56 = arith.select %49, %52, %55 : vector<2x128xi1>, vector<2x128xf32>
    %cst_50 = arith.constant dense<0.000000e+00> : vector<128xf32>
    %57 = vector.multi_reduction <add>, %56, %cst_50 [0] : vector<2x128xf32> to vector<128xf32>
    %58 = arith.addf %54, %57 : vector<128xf32>
    %c1_51 = arith.constant 1 : index
    %c0_52 = arith.constant 0 : index
    %59 = vector.load %arg5[%c1_51, %c0_52] : memref<4x128xf32, #tpu.memory_space<vmem>>, vector<1x128xf32>
    %60 = vector.shape_cast %59 : vector<1x128xf32> to vector<128xf32>
    %61 = vector.shape_cast %58 : vector<128xf32> to vector<1x128xf32>
    tpu.vector_store %arg5[%c1_51, %c0_52], %61 {strides = array<i32>} : memref<4x128xf32, #tpu.memory_space<vmem>>, vector<1x128xf32>,
    %c1_53 = arith.constant 1 : index
    %c0_54 = arith.constant 0 : index
    %62 = vector.load %arg6[%c1_53, %c0_54] : memref<4x128xf32, #tpu.memory_space<vmem>>, vector<1x128xf32>
    %63 = vector.shape_cast %62 : vector<1x128xf32> to vector<128xf32>
    %cst_55 = arith.constant 1.000000e+00 : f32
    %cst_56 = arith.constant 0.000000e+00 : f32
    %64 = vector.broadcast %cst_55 : f32 to vector<2x128xf32>
    %65 = vector.broadcast %cst_56 : f32 to vector<2x128xf32>
    %66 = arith.select %49, %64, %65 : vector<2x128xi1>, vector<2x128xf32>
    %cst_57 = arith.constant dense<0.000000e+00> : vector<128xf32>
    %67 = vector.multi_reduction <add>, %66, %cst_57 [0] : vector<2x128xf32> to vector<128xf32>
    %68 = arith.addf %63, %67 : vector<128xf32>
    %c1_58 = arith.constant 1 : index
    %c0_59 = arith.constant 0 : index
    %69 = vector.load %arg6[%c1_58, %c0_59] : memref<4x128xf32, #tpu.memory_space<vmem>>, vector<1x128xf32>
    %70 = vector.shape_cast %69 : vector<1x128xf32> to vector<128xf32>
    %71 = vector.shape_cast %68 : vector<128xf32> to vector<1x128xf32>
    tpu.vector_store %arg6[%c1_58, %c0_59], %71 {strides = array<i32>} : memref<4x128xf32, #tpu.memory_space<vmem>>, vector<1x128xf32>,
    %c1_60 = arith.constant 1 : index
    %c0_61 = arith.constant 0 : index
    %72 = vector.load %arg7[%c1_60, %c0_61] : memref<4x128xf32, #tpu.memory_space<vmem>>, vector<1x128xf32>
    %73 = vector.shape_cast %72 : vector<1x128xf32> to vector<128xf32>
    %cst_62 = arith.constant dense<0.000000e+00> : vector<128xf32>
    %74 = vector.multi_reduction <add>, %52, %cst_62 [0] : vector<2x128xf32> to vector<128xf32>
    %75 = arith.addf %73, %74 : vector<128xf32>
    %c1_63 = arith.constant 1 : index
    %c0_64 = arith.constant 0 : index
    %76 = vector.load %arg7[%c1_63, %c0_64] : memref<4x128xf32, #tpu.memory_space<vmem>>, vector<1x128xf32>
    %77 = vector.shape_cast %76 : vector<1x128xf32> to vector<128xf32>
    %78 = vector.shape_cast %75 : vector<128xf32> to vector<1x128xf32>
    tpu.vector_store %arg7[%c1_63, %c0_64], %78 {strides = array<i32>} : memref<4x128xf32, #tpu.memory_space<vmem>>, vector<1x128xf32>,
    %c0_65 = arith.constant 0 : index
    %c2_66 = arith.constant 2 : index
    %c0_67 = arith.constant 0 : index
    %c0_68 = arith.constant 0 : index
    %79 = vector.load %arg2[%c0_65, %c2_66, %c0_67, %c0_68] : memref<1x4x2x128xf32, #tpu.memory_space<vmem>>, vector<1x1x2x128xf32>
    %80 = vector.shape_cast %79 : vector<1x1x2x128xf32> to vector<2x128xf32>
    %81 = arith.cmpf oeq, %80, %13 : vector<2x128xf32>
    %cst_69 = arith.constant dense<true> : vector<2x128xi1>
    %82 = arith.xori %50, %cst_69 : vector<2x128xi1>
    %83 = arith.andi %81, %82 : vector<2x128xi1>
    %84 = arith.ori %50, %81 : vector<2x128xi1>
    %c0_70 = arith.constant 0 : index
    %c2_71 = arith.constant 2 : index
    %c0_72 = arith.constant 0 : index
    %c0_73 = arith.constant 0 : index
    %85 = vector.load %arg3[%c0_70, %c2_71, %c0_72, %c0_73] : memref<1x4x2x128xf32, #tpu.memory_space<vmem>>, vector<1x1x2x128xf32>
    %86 = vector.shape_cast %85 : vector<1x1x2x128xf32> to vector<2x128xf32>
    %c2_74 = arith.constant 2 : index
    %c0_75 = arith.constant 0 : index
    %87 = vector.load %arg5[%c2_74, %c0_75] : memref<4x128xf32, #tpu.memory_space<vmem>>, vector<1x128xf32>
    %88 = vector.shape_cast %87 : vector<1x128xf32> to vector<128xf32>
    %cst_76 = arith.constant 0.000000e+00 : f32
    %89 = vector.broadcast %cst_76 : f32 to vector<2x128xf32>
    %90 = arith.select %83, %86, %89 : vector<2x128xi1>, vector<2x128xf32>
    %cst_77 = arith.constant dense<0.000000e+00> : vector<128xf32>
    %91 = vector.multi_reduction <add>, %90, %cst_77 [0] : vector<2x128xf32> to vector<128xf32>
    %92 = arith.addf %88, %91 : vector<128xf32>
    %c2_78 = arith.constant 2 : index
    %c0_79 = arith.constant 0 : index
    %93 = vector.load %arg5[%c2_78, %c0_79] : memref<4x128xf32, #tpu.memory_space<vmem>>, vector<1x128xf32>
    %94 = vector.shape_cast %93 : vector<1x128xf32> to vector<128xf32>
    %95 = vector.shape_cast %92 : vector<128xf32> to vector<1x128xf32>
    tpu.vector_store %arg5[%c2_78, %c0_79], %95 {strides = array<i32>} : memref<4x128xf32, #tpu.memory_space<vmem>>, vector<1x128xf32>,
    %c2_80 = arith.constant 2 : index
    %c0_81 = arith.constant 0 : index
    %96 = vector.load %arg6[%c2_80, %c0_81] : memref<4x128xf32, #tpu.memory_space<vmem>>, vector<1x128xf32>
    %97 = vector.shape_cast %96 : vector<1x128xf32> to vector<128xf32>
    %cst_82 = arith.constant 1.000000e+00 : f32
    %cst_83 = arith.constant 0.000000e+00 : f32
    %98 = vector.broadcast %cst_82 : f32 to vector<2x128xf32>
    %99 = vector.broadcast %cst_83 : f32 to vector<2x128xf32>
    %100 = arith.select %83, %98, %99 : vector<2x128xi1>, vector<2x128xf32>
    %cst_84 = arith.constant dense<0.000000e+00> : vector<128xf32>
    %101 = vector.multi_reduction <add>, %100, %cst_84 [0] : vector<2x128xf32> to vector<128xf32>
    %102 = arith.addf %97, %101 : vector<128xf32>
    %c2_85 = arith.constant 2 : index
    %c0_86 = arith.constant 0 : index
    %103 = vector.load %arg6[%c2_85, %c0_86] : memref<4x128xf32, #tpu.memory_space<vmem>>, vector<1x128xf32>
    %104 = vector.shape_cast %103 : vector<1x128xf32> to vector<128xf32>
    %105 = vector.shape_cast %102 : vector<128xf32> to vector<1x128xf32>
    tpu.vector_store %arg6[%c2_85, %c0_86], %105 {strides = array<i32>} : memref<4x128xf32, #tpu.memory_space<vmem>>, vector<1x128xf32>,
    %c2_87 = arith.constant 2 : index
    %c0_88 = arith.constant 0 : index
    %106 = vector.load %arg7[%c2_87, %c0_88] : memref<4x128xf32, #tpu.memory_space<vmem>>, vector<1x128xf32>
    %107 = vector.shape_cast %106 : vector<1x128xf32> to vector<128xf32>
    %cst_89 = arith.constant dense<0.000000e+00> : vector<128xf32>
    %108 = vector.multi_reduction <add>, %86, %cst_89 [0] : vector<2x128xf32> to vector<128xf32>
    %109 = arith.addf %107, %108 : vector<128xf32>
    %c2_90 = arith.constant 2 : index
    %c0_91 = arith.constant 0 : index
    %110 = vector.load %arg7[%c2_90, %c0_91] : memref<4x128xf32, #tpu.memory_space<vmem>>, vector<1x128xf32>
    %111 = vector.shape_cast %110 : vector<1x128xf32> to vector<128xf32>
    %112 = vector.shape_cast %109 : vector<128xf32> to vector<1x128xf32>
    tpu.vector_store %arg7[%c2_90, %c0_91], %112 {strides = array<i32>} : memref<4x128xf32, #tpu.memory_space<vmem>>, vector<1x128xf32>,
    %c0_92 = arith.constant 0 : index
    %c3_93 = arith.constant 3 : index
    %c0_94 = arith.constant 0 : index
    %c0_95 = arith.constant 0 : index
    %113 = vector.load %arg2[%c0_92, %c3_93, %c0_94, %c0_95] : memref<1x4x2x128xf32, #tpu.memory_space<vmem>>, vector<1x1x2x128xf32>
    %114 = vector.shape_cast %113 : vector<1x1x2x128xf32> to vector<2x128xf32>
    %115 = arith.cmpf oeq, %114, %13 : vector<2x128xf32>
    %cst_96 = arith.constant dense<true> : vector<2x128xi1>
    %116 = arith.xori %84, %cst_96 : vector<2x128xi1>
    %117 = arith.andi %115, %116 : vector<2x128xi1>
    %c0_97 = arith.constant 0 : index
    %c3_98 = arith.constant 3 : index
    %c0_99 = arith.constant 0 : index
    %c0_100 = arith.constant 0 : index
    %118 = vector.load %arg3[%c0_97, %c3_98, %c0_99, %c0_100] : memref<1x4x2x128xf32, #tpu.memory_space<vmem>>, vector<1x1x2x128xf32>
    %119 = vector.shape_cast %118 : vector<1x1x2x128xf32> to vector<2x128xf32>
    %c3_101 = arith.constant 3 : index
    %c0_102 = arith.constant 0 : index
    %120 = vector.load %arg5[%c3_101, %c0_102] : memref<4x128xf32, #tpu.memory_space<vmem>>, vector<1x128xf32>
    %121 = vector.shape_cast %120 : vector<1x128xf32> to vector<128xf32>
    %cst_103 = arith.constant 0.000000e+00 : f32
    %122 = vector.broadcast %cst_103 : f32 to vector<2x128xf32>
    %123 = arith.select %117, %119, %122 : vector<2x128xi1>, vector<2x128xf32>
    %cst_104 = arith.constant dense<0.000000e+00> : vector<128xf32>
    %124 = vector.multi_reduction <add>, %123, %cst_104 [0] : vector<2x128xf32> to vector<128xf32>
    %125 = arith.addf %121, %124 : vector<128xf32>
    %c3_105 = arith.constant 3 : index
    %c0_106 = arith.constant 0 : index
    %126 = vector.load %arg5[%c3_105, %c0_106] : memref<4x128xf32, #tpu.memory_space<vmem>>, vector<1x128xf32>
    %127 = vector.shape_cast %126 : vector<1x128xf32> to vector<128xf32>
    %128 = vector.shape_cast %125 : vector<128xf32> to vector<1x128xf32>
    tpu.vector_store %arg5[%c3_105, %c0_106], %128 {strides = array<i32>} : memref<4x128xf32, #tpu.memory_space<vmem>>, vector<1x128xf32>,
    %c3_107 = arith.constant 3 : index
    %c0_108 = arith.constant 0 : index
    %129 = vector.load %arg6[%c3_107, %c0_108] : memref<4x128xf32, #tpu.memory_space<vmem>>, vector<1x128xf32>
    %130 = vector.shape_cast %129 : vector<1x128xf32> to vector<128xf32>
    %cst_109 = arith.constant 1.000000e+00 : f32
    %cst_110 = arith.constant 0.000000e+00 : f32
    %131 = vector.broadcast %cst_109 : f32 to vector<2x128xf32>
    %132 = vector.broadcast %cst_110 : f32 to vector<2x128xf32>
    %133 = arith.select %117, %131, %132 : vector<2x128xi1>, vector<2x128xf32>
    %cst_111 = arith.constant dense<0.000000e+00> : vector<128xf32>
    %134 = vector.multi_reduction <add>, %133, %cst_111 [0] : vector<2x128xf32> to vector<128xf32>
    %135 = arith.addf %130, %134 : vector<128xf32>
    %c3_112 = arith.constant 3 : index
    %c0_113 = arith.constant 0 : index
    %136 = vector.load %arg6[%c3_112, %c0_113] : memref<4x128xf32, #tpu.memory_space<vmem>>, vector<1x128xf32>
    %137 = vector.shape_cast %136 : vector<1x128xf32> to vector<128xf32>
    %138 = vector.shape_cast %135 : vector<128xf32> to vector<1x128xf32>
    tpu.vector_store %arg6[%c3_112, %c0_113], %138 {strides = array<i32>} : memref<4x128xf32, #tpu.memory_space<vmem>>, vector<1x128xf32>,
    %c3_114 = arith.constant 3 : index
    %c0_115 = arith.constant 0 : index
    %139 = vector.load %arg7[%c3_114, %c0_115] : memref<4x128xf32, #tpu.memory_space<vmem>>, vector<1x128xf32>
    %140 = vector.shape_cast %139 : vector<1x128xf32> to vector<128xf32>
    %cst_116 = arith.constant dense<0.000000e+00> : vector<128xf32>
    %141 = vector.multi_reduction <add>, %119, %cst_116 [0] : vector<2x128xf32> to vector<128xf32>
    %142 = arith.addf %140, %141 : vector<128xf32>
    %c3_117 = arith.constant 3 : index
    %c0_118 = arith.constant 0 : index
    %143 = vector.load %arg7[%c3_117, %c0_118] : memref<4x128xf32, #tpu.memory_space<vmem>>, vector<1x128xf32>
    %144 = vector.shape_cast %143 : vector<1x128xf32> to vector<128xf32>
    %145 = vector.shape_cast %142 : vector<128xf32> to vector<1x128xf32>
    tpu.vector_store %arg7[%c3_117, %c0_118], %145 {strides = array<i32>} : memref<4x128xf32, #tpu.memory_space<vmem>>, vector<1x128xf32>,
    %c0_i32_119 = arith.constant 0 : i32
    %146 = arith.cmpi eq, %arg1, %c0_i32_119 : i32
    %147 = arith.extui %146 : i1 to i32
    %c0_i32_120 = arith.constant 0 : i32
    %148 = arith.cmpi ne, %147, %c0_i32_120 : i32
    scf.if %148 {
      %c0_121 = arith.constant 0 : index
      %c0_122 = arith.constant 0 : index
      %149 = vector.load %arg5[%c0_121, %c0_122] : memref<4x128xf32, #tpu.memory_space<vmem>>, vector<4x128xf32>
      %cst_123 = arith.constant dense<0.000000e+00> : vector<4xf32>
      %150 = vector.multi_reduction <add>, %149, %cst_123 [1] : vector<4x128xf32> to vector<4xf32>
      %cst_124 = arith.constant 9.99999974E-6 : f32
      %151 = vector.broadcast %cst_124 : f32 to vector<4xf32>
      %152 = arith.addf %150, %151 : vector<4xf32>
      %c0_125 = arith.constant 0 : index
      %c0_126 = arith.constant 0 : index
      %153 = vector.load %arg6[%c0_125, %c0_126] : memref<4x128xf32, #tpu.memory_space<vmem>>, vector<4x128xf32>
      %cst_127 = arith.constant dense<0.000000e+00> : vector<4xf32>
      %154 = vector.multi_reduction <add>, %153, %cst_127 [1] : vector<4x128xf32> to vector<4xf32>
      %c0_128 = arith.constant 0 : index
      %c0_129 = arith.constant 0 : index
      %155 = vector.load %arg7[%c0_128, %c0_129] : memref<4x128xf32, #tpu.memory_space<vmem>>, vector<4x128xf32>
      %cst_130 = arith.constant dense<0.000000e+00> : vector<4xf32>
      %156 = vector.multi_reduction <add>, %155, %cst_130 [1] : vector<4x128xf32> to vector<4xf32>
      %157 = arith.addf %154, %156 : vector<4xf32>
      %cst_131 = arith.constant 9.99999974E-6 : f32
      %158 = vector.broadcast %cst_131 : f32 to vector<4xf32>
      %159 = arith.addf %157, %158 : vector<4xf32>
      %cst_132 = arith.constant 2.000000e+00 : f32
      %160 = vector.broadcast %cst_132 : f32 to vector<4xf32>
      %161 = arith.mulf %160, %152 : vector<4xf32>
      %162 = arith.divf %161, %159 : vector<4xf32>
      %c0_133 = arith.constant 0 : index
      %c0_134 = arith.constant 0 : index
      %c0_135 = arith.constant 0 : index
      %163 = vector.load %arg4[%c0_133, %c0_134, %c0_135] : memref<1x1x4xf32, #tpu.memory_space<vmem>>, vector<1x1x4xf32>
      %164 = vector.shape_cast %163 : vector<1x1x4xf32> to vector<4xf32>
      %165 = vector.shape_cast %162 : vector<4xf32> to vector<1x1x4xf32>
      tpu.vector_store %arg4[%c0_133, %c0_134, %c0_135], %165 {strides = array<i32>} : memref<1x1x4xf32, #tpu.memory_space<vmem>>, vector<1x1x4xf32>,
    } else {
    }
    return
  }
  func.func @transform_0(%arg0: i32, %arg1: i32) -> (i32, i32, i32, i32) {
    %c0_i32 = arith.constant 0 : i32
    %c0_i32_0 = arith.constant 0 : i32
    %c0_i32_1 = arith.constant 0 : i32
    return %arg0, %c0_i32, %arg1, %c0_i32_0 : i32, i32, i32, i32
  }
  func.func @transform_1(%arg0: i32, %arg1: i32) -> (i32, i32, i32, i32) {
    %c0_i32 = arith.constant 0 : i32
    %c0_i32_0 = arith.constant 0 : i32
    %c0_i32_1 = arith.constant 0 : i32
    return %arg0, %c0_i32, %arg1, %c0_i32_0 : i32, i32, i32, i32
  }
  func.func @transform_2(%arg0: i32, %arg1: i32) -> (i32, i32, i32) {
    %c0_i32 = arith.constant 0 : i32
    %c0_i32_0 = arith.constant 0 : i32
    %c0_i32_1 = arith.constant 0 : i32
    return %arg0, %c0_i32, %c0_i32_0 : i32, i32, i32
  }
}

</mosaic_0001>

<bundles_post_ra>
// kernel: tpu_custom_call.1
= control target key start
LH: loop header
LB: loop body
LE: loop exit
PB: predicated region body
PF: predicated region fallthrough
CT: control target
= control target key end

     0   :  { %7 = vsyncpa [#allocation6], 0  ;;  %s1106_s0 = inlined_call_operand.hbm [shape: f32[2,4,2,128], index: 0, kind: input, shape index: {}]   ;;  %s1107_s1 = inlined_call_operand.hbm [shape: f32[2,4,2,128], index: 1, kind: input, shape index: {}]   ;;  %s1108_s2 = inlined_call_operand.hbm [shape: f32[2,1,4], index: 2, kind: output, shape index: {}]  }
   0x1   :  { %9 = vsyncpa [#allocation6 + $0x1], 0 }
   0x2   :  { %10 = vsyncpa [#allocation9], 0 }
   0x3   :  { %12 = vsyncpa [#allocation9 + $0x1], 0 }
   0x4   :  { %13 = vsyncpa [#allocation7], 0 }
   0x5   :  { %15 = vsyncpa [#allocation7 + $0x1], 0  ;;  %s803_s9 = smov 0   ;;  %s805_s10 = smov 0  }
   0x6   :  { %s807_s11 = smov 0   ;;  %s809_s12 = smov 0  }
   0x7   :  { %s811_s13 = smov 0   ;;  %s813_s14 = smov 0  }
   0x8 LB: > { %s533_s15 = sadd.s32 4294967295, %s779_s14   ;;  %s534_s16 = sadd.s32 4294967294, %s779_s14   ;;  %s779_s14 = sphi %s813_s14, %s21_s14   ;;  %s775_s13 = sphi %s811_s13, %s1132_s13   ;;  %s771_s12 = sphi %s809_s12, %s1131_s12   ;;  %s767_s11 = sphi %s807_s11, %s1130_s11   ;;  %s763_s10 = sphi %s805_s10, %s1129_s10   ;;  %s759_s9 = sphi %s803_s9, %s1128_s9  }
   0x9   : > { %s33_s17 = sadd.s32 1, %s775_s13  ;;  %s42_s18 = sadd.s32 1, %s767_s11 }
   0xa   : > { %p35_p0 = scmp.ge.s32.totalorder %s33_s17, 2  ;;  %p49_p1 = scmp.ne.s32.totalorder %s767_s11, %s763_s10 }
   0xb   : > { %p50_p2 = scmp.eq.s32.totalorder %s779_s14, 0  ;;  %p55_p3 = scmp.ne.s32.totalorder %s763_s10, %s759_s9 }
   0xc   : > { %s1134_s17 = smov (%p35_p0, %s33_s17), 0  ;;  %p56_p5 = scmp.eq.s32.totalorder %s533_s15, 0 }
   0xd   : > { %p844_p4 = por %p50_p2, %p49_p1  ;;  %s37_s20 = ssub.s32 %s775_s13, %s1134_s17 }
   0xe   : > { %p107_p6 = scmp.eq.s32.totalorder %s533_s15, 1  ;;  %p40_p7 = scmp.eq.s32.totalorder %s37_s20, 0 }
   0xf   : > { %p850_p8 = por %p56_p5, %p55_p3  ;;  %p113_p10 = scmp.eq.s32.totalorder %s534_s16, 1 }
  0x10   : > { %p854_p9 = por %p107_p6, %p49_p1  ;;  %p577_p13 = scmp.lt.s32.totalorder %s779_s14, 2 }
  0x11   : > { %s1112_s21 = scalar_select %p850_p8, 1, 0 }
  0x12   : > { %s1113_s22 = scalar_select %p854_p9, 1, 0 }
  0x13   : > { %s859_s23 = scalar_select %p40_p7, %s767_s11, %s42_s18  }
  0x14   : > { %p861_p11 = por %p113_p10, %p55_p3  ;;  %s868_s25 = sand.u32 1, %s767_s11  }
  0x15   : > { %s537_s26 = sshll.u32 %s868_s25, 3  ;;  %s558_s27 = sshll.u32 %s775_s13, 7 }
  0x16   : > { %s1114_s24 = scalar_select %p861_p11, 1, 0 }
  0x17   : > { %s877_s30 = scalar_lea.hbm %s1106_s0, %s558_s27  ;;  %s137_s3 = scalar_lea.vmem [#allocation5], %s537_s26 }
  0x18   : > { %s145_s4 = sshll.u32 %s137_s3, 4  ;;  %p885_p0 = pnand %p577_p13, %p844_p4  ;;  %s881_s4 = int_to_ptr.vmem [resolvable:$true] %s145_s4 }
  0x19   : > { %s134_s6 = scalar_lea.sflag [#allocation6], %s868_s25  ;;  %s633_s7 = scalar_lea.hbm %s877_s30, 128 }
  0x1a   : > { %p634_p2 = scmp.ne.s32.totalorder %s877_s30, %s633_s7  ;;  %p635_p3 = pneg %p885_p0 }
  0x1b   : > { %s638_s16 = scalar_lea.hbm %s1106_s0, 256  ;;  %p639_p4 = scmp.lt.u32.totalorder %s877_s30, %s1106_s0 }
  0x1c   : > { %p636_p5 = pnand %p635_p3, %p634_p2  ;;  %p640_p7 = scmp.lt.u32.totalorder %s638_s16, %s633_s7 }
  0x1d   : > { %p642_p13 = scmp.lt.u32.totalorder %s633_s7, %s877_s30 }
  0x1e   : > { %p637_p6 = pneg %p636_p5  ;;  %p641_p10 = por %p640_p7, %p639_p4 }
  0x20   : > { %p643_p12 = por %p642_p13, %p641_p10 }
  0x22   : > { %p644_p1 = pnand %p643_p12, %p637_p6 }
  0x24   : > { %647 = shalt.err (!%p644_p1)
}
  0x25   : > { %s648_s20 = scalar_lea.vmem %s881_s4, 128  ;;  %s781_s28 = smov [#allocation5]  }
  0x26   : > { %p649_p2 = scmp.ne.s32.totalorder %s881_s4, %s648_s20  ;;  %s653_s29 = sshll.u32 %s781_s28, 4  ;;  %s654_s29 = int_to_ptr.vmem [resolvable:$false] %s653_s29 }
  0x27   : > { %s655_s3 = scalar_lea.vmem %s654_s29, 256  ;;  %p656_p9 = scmp.lt.s32.totalorder %s881_s4, %s654_s29 }
  0x28   : > { %p651_p5 = pnand %p649_p2, %p635_p3  ;;  %p657_p4 = scmp.lt.s32.totalorder %s655_s3, %s648_s20 }
  0x2a   : > { %p652_p11 = pneg %p651_p5  ;;  %p658_p7 = por %p657_p4, %p656_p9 }
  0x2c   : > { %p659_p10 = pnand %p658_p7, %p652_p11 }
  0x2e   : > { %662 = shalt.err (!%p659_p10)
}
  0x2f   : > { %s782_s7 = smov 32   ;;  %s783_s8 = smov 2  }
  0x30   : > { %569 = dma.hbm_to_vmem [thread:$0]  (!%p885_p0), %s877_s30, 128, %s881_s4, %s134_s6, %s782_s7, %s782_s7, %s783_s8  }
  0x31   : > { %p175_p9 = scmp.lt.s32.totalorder %s779_s14, 3  ;;  %s927_s18 = scalar_lea.hbm %s1107_s1, %s558_s27 }
  0x32   : > { %p1116_p11 = scmp.ge.s32.totalorder %s779_s14, 1  ;;  %s159_s20 = scalar_lea.vmem [#allocation8], %s537_s26 }
  0x33   : > { %s167_s28 = sshll.u32 %s159_s20, 4  ;;  %s156_s30 = scalar_lea.sflag [#allocation9], %s868_s25  ;;  %s937_s28 = int_to_ptr.vmem [resolvable:$true] %s167_s28 }
  0x34   : > { %p931_p12 = pnand %p1116_p11, %p175_p9  ;;  %s663_s4 = scalar_lea.hbm %s927_s18, 128 }
  0x35   : > { %p664_p1 = scmp.ne.s32.totalorder %s927_s18, %s663_s4  ;;  %s668_s29 = scalar_lea.hbm %s1107_s1, 256 }
  0x36   : > { %p669_p2 = scmp.lt.u32.totalorder %s927_s18, %s1107_s1  ;;  %p670_p5 = scmp.lt.u32.totalorder %s668_s29, %s663_s4 }
  0x37   : > { %p666_p6 = pnand %p664_p1, %p635_p3  ;;  %p672_p7 = scmp.lt.u32.totalorder %s663_s4, %s927_s18 }
  0x38   : > { %p671_p4 = por %p670_p5, %p669_p2 }
  0x39   : > { %p667_p13 = pneg %p666_p6 }
  0x3a   : > { %p673_p10 = por %p672_p7, %p671_p4 }
  0x3c   : > { %p674_p9 = pnand %p673_p10, %p667_p13 }
  0x3e   : > { %677 = shalt.err (!%p674_p9)
}
  0x3f   : > { %s678_s26 = scalar_lea.vmem %s937_s28, 128  ;;  %s784_s16 = smov [#allocation8]  }
  0x40   : > { %p679_p11 = scmp.ne.s32.totalorder %s937_s28, %s678_s26  ;;  %s683_s20 = sshll.u32 %s784_s16, 4  ;;  %s684_s20 = int_to_ptr.vmem [resolvable:$false] %s683_s20 }
  0x41   : > { %s685_s27 = scalar_lea.vmem %s684_s20, 256  ;;  %p686_p8 = scmp.lt.s32.totalorder %s937_s28, %s684_s20 }
  0x42   : > { %p681_p1 = pnand %p679_p11, %p635_p3  ;;  %p687_p2 = scmp.lt.s32.totalorder %s685_s27, %s678_s26 }
  0x44   : > { %p682_p6 = pneg %p681_p1  ;;  %p688_p5 = por %p687_p2, %p686_p8 }
  0x46   : > { %p689_p4 = pnand %p688_p5, %p682_p6 }
  0x48   : > { %692 = shalt.err (!%p689_p4)
}
  0x49   : > { %572 = dma.hbm_to_vmem [thread:$0]  (!%p885_p0), %s927_s18, 128, %s937_s28, %s156_s30, %s782_s7, %s782_s7, %s783_s8  }
  0x4a   : > { %179 = sbr.rel (%p931_p12) target bundleno = 304 (0x130), region = 28  ;;  %s971_s4 = sand.u32 (!%p931_p12), 1, %s763_s10  }
  0x4b   : > { %s544_s6 = sshll.u32 (!%p931_p12), %s971_s4, 3  ;;  %s182_s29 = scalar_lea.sflag (!%p931_p12), [#allocation6], %s971_s4 }
  0x4c   : > { %s185_s5 = scalar_lea.vmem (!%p931_p12), [#allocation5], %s544_s6  ;;  %p1118_p8 = scmp.ne.s32.totalorder (!%p931_p12), %s1112_s21, 0 }
  0x51   : > { %746 = dma.done.wait (%p1118_p8), %s182_s29, 128  }
  0x52   : > { %748 = vsyncadd (%p1118_p8), %s182_s29, 4294967168  ;;  %s191_s25 = scalar_lea.sflag [#allocation9], %s971_s4  ;;  %s194_s7 = scalar_lea.vmem [#allocation8], %s544_s6 }
  0x53   : > { %750 = dma.done.wait (%p1118_p8), %s191_s25, 128  }
  0x54   : > { %752 = vsyncadd (%p1118_p8), %s191_s25, 4294967168  ;;  %v785_v0 = vmov 0.0   ;;  %v226_v1 = vld [vmem:[%s185_s5] sm:$0x3]  ;;  %v546_v2 = vld [vmem:[%s185_s5 + $0x2] sm:$0x3] }
  0x55   : > { %224 = vst [vmem:[#allocation3] sm:$0xf] %v785_v0  ;;  %223 = vst [vmem:[#allocation2] sm:$0xf] %v785_v0  ;;  %v547_v3 = vld [vmem:[%s185_s5 + $0x4] sm:$0x3]  ;;  %v229_v4 = vmax.f32 %v226_v1, %v546_v2 }
  0x56   : > { %225 = vst [vmem:[#allocation4] sm:$0xf] %v785_v0  ;;  %v548_v5 = vld [vmem:[%s185_s5 + $0x6] sm:$0x3]  ;;  %vm240_vm0 = vcmask 1041408   ;;  %vm786_vm4 = vmmov 1  }
  0x57   : > { %v232_v6 = vmax.f32 %v229_v4, %v547_v3  ;;  %v549_v7 = vld [vmem:[%s185_s5 + $0x2] sm:$0x3]  ;;  %v237_v8 = vld [vmem:[%s194_s7] sm:$0x3]  ;;  %v551_v9 = vld [vmem:[%s185_s5 + $0x4] sm:$0x3] }
  0x58   : > { %v262_v10 = vsel %vm240_vm0, %v237_v8, 0.0  ;;  %v988_v11 = vld [vmem:[%s194_s7 + $0x2] sm:$0x3]  ;;  %v992_v15 = vld [vmem:[%s194_s7 + $0x4] sm:$0x3]  ;;  %vm391_vm14 = vcmask 1043456  }
  0x59   : > { %v235_v12 = vmax.f32 %v232_v6, %v548_v5  ;;  %v263_v13 = vrot.slane %v262_v10, 4  ;;  %v301_v14 = vsel %vm240_vm0, %v988_v11, 0.0  ;;  %v553_v16 = vld [vmem:[%s185_s5 + $0x6] sm:$0x3]  ;;  %v340_v18 = vsel %vm240_vm0, %v992_v15, 0.0  ;;  %s555_s21 = sshll.u32 %s771_s12, 4 }
  0x5a   : > { %v302_v17 = vrot.slane %v301_v14, 4  ;;  %v996_v19 = vld [vmem:[%s194_s7 + $0x6] sm:$0x3]  ;;  %v341_v23 = vrot.slane %v340_v18, 4  ;;  %s218_s8 = scalar_lea.vmem [#allocation10], %s971_s4  ;;  %vm417_vm15 = vcmask 24576   ;;  %s1057_s30 = scalar_lea.hbm %s1108_s2, %s555_s21 }
  0x5b   : > { %vm236_vm1 = vcmp.eq.f32.partialorder %v226_v1, %v235_v12  ;;  %vm272_vm2 = vcmp.eq.f32.partialorder %v549_v7, %v235_v12  ;;  %vm311_vm3 = vcmp.eq.f32.partialorder %v551_v9, %v235_v12  ;;  %v264_v21 = vadd.f32 %v263_v13, %v262_v10  ;;  %s432_s18 = sshll.u32 %s218_s8, 4  ;;  %s420_s3 = scalar_lea.sflag [#allocation7], %s971_s4  ;;  %s1059_s18 = int_to_ptr.vmem [resolvable:$true] %s432_s18 }
  0x5c   : > { %v251_v20 = vsel %vm236_vm1, 1.0, %v785_v0  ;;  %vm273_vm5 = vmxor %vm236_vm1, %vm786_vm4  ;;  %v303_v22 = vadd.f32 %v302_v17, %v301_v14  ;;  %vm350_vm7 = vcmp.eq.f32.partialorder %v553_v16, %v235_v12  ;;  %v378_v26 = vsel %vm240_vm0, %v996_v19, 0.0  ;;  %v250_v6 = vld [vmem:[#allocation3] sm:$0x1]  ;;  %v289_v16 = vld [vmem:[#allocation3 + $0x1] sm:$0x1] }
  0x5d   : > { %v252_v24 = vsel %vm240_vm0, %v251_v20, 0.0  ;;  %vm1003_vm6 = vmand %vm272_vm2, %vm273_vm5  ;;  %v239_v27 = vsel %vm236_vm1, %v237_v8, 0.0  ;;  %v265_v30 = vrot.slane %v264_v21, 2  ;;  %v342_v33 = vadd.f32 %v341_v23, %v340_v18  ;;  %v261_v51 = vld [vmem:[#allocation4] sm:$0x1]  ;;  %s693_s15 = scalar_lea.vmem %s1059_s18, 16 }
  0x5e   : > { %v253_v28 = vrot.slane %v252_v24, 4  ;;  %vm275_vm8 = vmor %vm236_vm1, %vm272_vm2  ;;  %v290_v29 = vsel %vm1003_vm6, 1.0, %v785_v0  ;;  %v304_v31 = vrot.slane %v303_v22, 2  ;;  %v379_v34 = vrot.slane %v378_v26, 4  ;;  %v300_v59 = vld [vmem:[#allocation4 + $0x1] sm:$0x1]  ;;  %p694_p0 = scmp.ne.s32.totalorder %s1059_s18, %s693_s15 }
  0x5f   : > { %v291_v32 = vsel %vm240_vm0, %v290_v29, 0.0  ;;  %vm312_vm9 = vmxor %vm275_vm8, %vm786_vm4  ;;  %v241_v35 = vsel %vm240_vm0, %v239_v27, 0.0  ;;  %v266_v39 = vadd.f32 %v265_v30, %v264_v21  ;;  %v343_v42 = vrot.slane %v342_v33, 2  ;;  %v339_v5 = vld [vmem:[#allocation4 + $0x2] sm:$0x1]  ;;  %p1125_p3 = scmp.ne.s32.totalorder %s1113_s22, 0 }
  0x60   : > { %v254_v36 = vadd.f32 %v253_v28, %v252_v24  ;;  %v292_v37 = vrot.slane %v291_v32, 4  ;;  %vm1018_vm10 = vmand %vm311_vm3, %vm312_vm9  ;;  %v305_v40 = vadd.f32 %v304_v31, %v303_v22  ;;  %v380_v43 = vadd.f32 %v379_v34, %v378_v26  ;;  %v377_v26 = vld [vmem:[#allocation4 + $0x3] sm:$0x1]  ;;  %s787_s12 = smov [#allocation10]  }
  0x61   : > { %vm314_vm11 = vmor %vm275_vm8, %vm311_vm3  ;;  %v329_v41 = vsel %vm1018_vm10, 1.0, %v785_v0  ;;  %v242_v44 = vrot.slane %v241_v35, 4  ;;  %v267_v48 = vrot.slane %v266_v39, 1  ;;  %v344_v53 = vadd.f32 %v343_v42, %v342_v33  ;;  %v328_v33 = vld [vmem:[#allocation3 + $0x2] sm:$0x1]  ;;  %p695_p12 = pnand %p694_p0, %p1125_p3  ;;  %s697_s26 = sshll.u32 %s787_s12, 4  ;;  %s698_s26 = int_to_ptr.vmem [resolvable:$false] %s697_s26 }
  0x62   : > { %v255_v45 = vrot.slane %v254_v36, 2  ;;  %v293_v46 = vadd.f32 %v292_v37, %v291_v32  ;;  %v330_v47 = vsel %vm240_vm0, %v329_v41, 0.0  ;;  %vm351_vm12 = vmxor %vm314_vm11, %vm786_vm4  ;;  %v306_v52 = vrot.slane %v305_v40, 1  ;;  %s699_s16 = scalar_lea.vmem %s698_s26, 32  ;;  %p700_p7 = scmp.lt.s32.totalorder %s1059_s18, %s698_s26 }
  0x63   : > { %v331_v49 = vrot.slane %v330_v47, 4  ;;  %vm1029_vm13 = vmand %vm350_vm7, %vm351_vm12  ;;  %v381_v54 = vrot.slane %v380_v43, 2  ;;  %v268_v58 = vadd.f32 %v267_v48, %v266_v39  ;;  %v345_v63 = vrot.slane %v344_v53, 1  ;;  %p696_p13 = pneg %p695_p12  ;;  %p701_p10 = scmp.lt.s32.totalorder %s699_s16, %s693_s15 }
  0x64   : > { %v256_v55 = vadd.f32 %v255_v45, %v254_v36  ;;  %v294_v56 = vrot.slane %v293_v46, 2  ;;  %v367_v57 = vsel %vm1029_vm13, 1.0, %v785_v0  ;;  %v307_v62 = vadd.f32 %v306_v52, %v305_v40 }
  0x65   : > { %v332_v60 = vadd.f32 %v331_v49, %v330_v47  ;;  %v368_v61 = vsel %vm240_vm0, %v367_v57, 0.0  ;;  %v269_v4 = vadd.f32 %v268_v58, %v261_v51  ;;  %v346_v9 = vadd.f32 %v345_v63, %v344_v53  ;;  %v278_v57 = vld [vmem:[#allocation2 + $0x1] sm:$0x1]  ;;  %p702_p9 = por %p701_p10, %p700_p7 }
  0x66   : > { %v257_v1 = vrot.slane %v256_v55, 1  ;;  %v295_v2 = vadd.f32 %v294_v56, %v293_v46  ;;  %v369_v3 = vrot.slane %v368_v61, 4  ;;  %v308_v8 = vadd.f32 %v307_v62, %v300_v59 }
  0x67   : > { %v333_v7 = vrot.slane %v332_v60, 2  ;;  %v382_v10 = vadd.f32 %v381_v54, %v380_v43  ;;  %270 = vst [vmem:[#allocation4] sm:$0x1] %v269_v4  ;;  %v243_v14 = vadd.f32 %v242_v44, %v241_v35  ;;  %v347_v18 = vadd.f32 %v346_v9, %v339_v5  ;;  %v366_v43 = vld [vmem:[#allocation3 + $0x3] sm:$0x1]  ;;  %p703_p11 = pnand %p702_p9, %p696_p13 }
  0x68   : > { %v258_v12 = vadd.f32 %v257_v1, %v256_v55  ;;  %v296_v13 = vrot.slane %v295_v2, 1  ;;  %v370_v0 = vadd.f32 %v369_v3, %v368_v61  ;;  %309 = vst [vmem:[#allocation4 + $0x1] sm:$0x1] %v308_v8  ;;  %v279_v21 = vsel %vm1003_vm6, %v988_v11, 0.0  ;;  %v238_v44 = vld [vmem:[#allocation2] sm:$0x1] }
  0x69   : > { %v334_v17 = vadd.f32 %v333_v7, %v332_v60  ;;  %v383_v20 = vrot.slane %v382_v10, 1  ;;  %v244_v27 = vrot.slane %v243_v14, 2  ;;  %348 = vst [vmem:[#allocation4 + $0x2] sm:$0x1] %v347_v18  ;;  %v280_v30 = vsel %vm240_vm0, %v279_v21, 0.0 }
  0x6a   : > { %v259_v22 = vadd.f32 %v258_v12, %v250_v6  ;;  %v297_v23 = vadd.f32 %v296_v13, %v295_v2  ;;  %v371_v24 = vrot.slane %v370_v0, 2  ;;  %v318_v31 = vsel %vm1018_vm10, %v992_v15, 0.0  ;;  %v317_v61 = vld [vmem:[#allocation2 + $0x2] sm:$0x1]  ;;  %v355_v4 = vld [vmem:[#allocation2 + $0x3] sm:$0x1] }
  0x6b   : > { %v335_v28 = vrot.slane %v334_v17, 1  ;;  %v384_v29 = vadd.f32 %v383_v20, %v382_v10  ;;  %v245_v25 = vadd.f32 %v244_v27, %v243_v14  ;;  %v281_v11 = vrot.slane %v280_v30, 4 }
  0x6c   : > { %260 = vst [vmem:[#allocation3] sm:$0x1] %v259_v22  ;;  %v298_v32 = vadd.f32 %v297_v23, %v289_v16  ;;  %v372_v34 = vadd.f32 %v371_v24, %v370_v0  ;;  %v319_v37 = vsel %vm240_vm0, %v318_v31, 0.0  ;;  %v356_v39 = vsel %vm1029_vm13, %v996_v19, 0.0 }
  0x6d   : > { %v336_v35 = vadd.f32 %v335_v28, %v334_v17  ;;  %v385_v36 = vadd.f32 %v384_v29, %v377_v26  ;;  %v246_v41 = vrot.slane %v245_v25, 1  ;;  %v282_v42 = vadd.f32 %v281_v11, %v280_v30 }
  0x6e   : > { %299 = vst [vmem:[#allocation3 + $0x1] sm:$0x1] %v298_v32  ;;  %v373_v40 = vrot.slane %v372_v34, 1  ;;  %v320_v38 = vrot.slane %v319_v37, 4  ;;  %v357_v45 = vsel %vm240_vm0, %v356_v39, 0.0  ;;  %v410_v18 = vlaneseq }
  0x6f   : > { %v337_v15 = vadd.f32 %v336_v35, %v328_v33  ;;  %386 = vst [vmem:[#allocation4 + $0x3] sm:$0x1] %v385_v36  ;;  %v247_v47 = vadd.f32 %v246_v41, %v245_v25  ;;  %v283_v48 = vrot.slane %v282_v42, 2  ;;  %v358_v51 = vrot.slane %v357_v45, 4 }
  0x70   : > { %v374_v46 = vadd.f32 %v373_v40, %v372_v34  ;;  %v321_v49 = vadd.f32 %v320_v38, %v319_v37  ;;  %v411_v22 = vand.u32 127, %v410_v18  ;;  %v413_v23 = vshrl.u32 %v410_v18, 7 }
  0x71   : > { %338 = vst [vmem:[#allocation3 + $0x2] sm:$0x1] %v337_v15  ;;  %v248_v50 = vadd.f32 %v247_v47, %v238_v44  ;;  %v284_v19 = vadd.f32 %v283_v48, %v282_v42  ;;  %v359_v54 = vadd.f32 %v358_v51, %v357_v45 }
  0x72   : > { %v375_v52 = vadd.f32 %v374_v46, %v366_v43  ;;  %v322_v53 = vrot.slane %v321_v49, 2  ;;  %v414_v26 = vsub.s32 %v411_v22, %v413_v23 }
  0x73   : > { %249 = vst [vmem:[#allocation2] sm:$0x1] %v248_v50  ;;  %v285_v55 = vrot.slane %v284_v19, 1  ;;  %v360_v58 = vrot.slane %v359_v54, 2 }
  0x74   : > { %376 = vst [vmem:[#allocation3 + $0x3] sm:$0x1] %v375_v52  ;;  %v323_v56 = vadd.f32 %v322_v53, %v321_v49 }
  0x75   : > { %v286_v59 = vadd.f32 %v285_v55, %v284_v19  ;;  %v361_v62 = vadd.f32 %v360_v58, %v359_v54 }
  0x76   : > { %v324_v60 = vrot.slane %v323_v56, 1  ;;  %v400_v6 = vld [vmem:[#allocation4] sm:$0xf] }
  0x77   : > { %v287_v63 = vadd.f32 %v286_v59, %v278_v57  ;;  %v362_v2 = vrot.slane %v361_v62, 1  ;;  %v401_v10 = vsel %vm391_vm14, %v400_v6, 0.0 }
  0x78   : > { %v325_v1 = vadd.f32 %v324_v60, %v323_v56 }
  0x79   : > { %288 = vst [vmem:[#allocation2 + $0x1] sm:$0x1] %v287_v63  ;;  %v363_v7 = vadd.f32 %v362_v2, %v361_v62 }
  0x7a   : > { %v326_v3 = vadd.f32 %v325_v1, %v317_v61 }
  0x7b   : > { %v396_v5 = vld [vmem:[#allocation3] sm:$0xf]  ;;  %v364_v9 = vadd.f32 %v363_v7, %v355_v4 }
  0x7c   : > { %v397_v8 = vsel %vm391_vm14, %v396_v5, 0.0  ;;  %327 = vst [vmem:[#allocation2 + $0x2] sm:$0x1] %v326_v3 }
  0x7d   : > { %398 = vadd.xlane.f32.xlu0 %v397_v8  ;;  %365 = vst [vmem:[#allocation2 + $0x3] sm:$0x1] %v364_v9 }
  0x81   : > { %402 = vadd.xlane.f32.xlu0 %v401_v10 }
  0x84   : > { %v390_v12 = vld [vmem:[#allocation2] sm:$0xf] }
  0x85   : > { %v392_v13 = vsel %vm391_vm14, %v390_v12, 0.0 }
  0x86   : > { %393 = vadd.xlane.f32.xlu1 %v392_v13 }
 0x10a   : > { %v399_v0 = vpop.xlane.xlu0 %398 }
 0x10e   : > { %v403_v14 = vpop.xlane.xlu0 %402 }
 0x10f   : > { %v404_v16 = vadd.f32 %v403_v14, %v399_v0 }
 0x111   : > { %v405_v17 = vadd.f32 1e-05, %v404_v16 }
 0x113   : > { %631 = vrcp.f32 %v405_v17  ;;  %v394_v20 = vpop.xlane.xlu1 %393 }
 0x114   : > { %v395_v21 = vadd.f32 1e-05, %v394_v20 }
 0x116   : > { %v406_v24 = vmul.f32 2.0, %v395_v21 }
 0x11d   : > { %v632_v27 = vpop.eup %631 }
 0x11e   : > { %v408_v28 = vmul.f32 %v632_v27, %v406_v24 }
 0x120   : > { %v415_v29 = vrot.slane %v408_v28, %v414_v26 }
 0x122   : > { %418 = vst.msk [vmem:[%s218_s8] sm:$0x1] %vm417_vm15, %v415_v29 }
 0x123   : > { %706 = shalt.err (!%p703_p11)
}
 0x124   : > { %s707_s20 = scalar_lea.hbm %s1057_s30, 16  ;;  %s711_s6 = scalar_lea.hbm %s1108_s2, 32 }
 0x125   : > { %p708_p1 = scmp.ne.s32.totalorder %s1057_s30, %s707_s20  ;;  %p712_p5 = scmp.lt.u32.totalorder %s1057_s30, %s1108_s2 }
 0x126   : > { %p713_p4 = scmp.lt.u32.totalorder %s711_s6, %s707_s20  ;;  %p715_p0 = scmp.lt.u32.totalorder %s707_s20, %s1057_s30 }
 0x127   : > { %p709_p6 = pnand %p708_p1, %p1125_p3 }
 0x128   : > { %p714_p8 = por %p713_p4, %p712_p5 }
 0x129   : > { %p710_p2 = pneg %p709_p6 }
 0x12a   : > { %p716_p12 = por %p715_p0, %p714_p8 }
 0x12c   : > { %p717_p13 = pnand %p716_p12, %p710_p2 }
 0x12e   : > { %720 = shalt.err (!%p717_p13)
}
 0x12f   : > { %564 = dma.vmem_to_hbm [thread:$0]  (%p1125_p3), %s1059_s18, 16, %s1057_s30, %s420_s3  }
 0x130 PF: > { %s444_s25 = sand.u32 1, %s759_s9   ;;  %p1126_p7 = scmp.ne.s32.totalorder %s1114_s24, 0 }
 0x131   : > { %p1127_p10 = scmp.ge.s32.totalorder %s779_s14, 2  ;;  %s445_s7 = scalar_lea.sflag [#allocation7], %s444_s25 }
 0x133   : > { %p574_p9 = pnand %p1127_p10, %p1126_p7 }
 0x135   : > { %754 = dma.done.wait (!%p574_p9), %s445_s7, 16  }
 0x136   : > { %756 = vsyncadd (!%p574_p9), %s445_s7, 4294967280  ;;  %s21_s14 = sadd.s32 1, %s779_s14   ;;  %s1128_s9 = smov %s763_s10 }
 0x137   : > { %p18_p11 = scmp.ge.s32.totalorder %s21_s14, 4   ;;  %s1129_s10 = smov %s767_s11 }
 0x138   : > { %s1130_s11 = smov %s859_s23  ;;  %s1131_s12 = smov %s775_s13 }
 0x139   : > { %s1132_s13 = smov %s1134_s17  ;;  %20 = sbr.rel (!%p18_p11) target bundleno = 8 (0x8), region = 100 }
 0x140   :  { %449 = vsyncpa [#allocation6], 1 }
 0x141   :  { %451 = vsyncpa [#allocation6 + $0x1], 1 }
 0x142   :  { %452 = vsyncpa [#allocation9], 1 }
 0x143   :  { %454 = vsyncpa [#allocation9 + $0x1], 1 }
 0x144   :  { %455 = vsyncpa [#allocation7], 1 }
 0x145   :  { %457 = vsyncpa [#allocation7 + $0x1], 1 }

</bundles_post_ra>
